<compile_context>
chip_gen: v7x
topology: tpu7x:2x2x1
jax: 0.10.0
libtpu: 0.0.40
codegen_flags: <defaults>
</compile_context>

<pallas_src>
import jax
import jax.numpy as jnp
from jax import lax
from jax.experimental import pallas as pl
from jax.experimental.pallas import tpu as pltpu


def _round_up(x, m):
    return ((x + m - 1) // m) * m


def _distmult_kernel(hr_ref, e_ref, o_ref):
    # hr_ref: (B, D)   grid-invariant (h * r), resident across all grid steps
    # e_ref:  (TN, D)  streamed tile of the entity table
    # o_ref:  (B, TN)  output score tile (lane-dense -> unmasked vst except the
    #                  ragged final block, which Pallas masks to N)
    #
    # NT matmul on the MXU: contract the last dim of both operands directly —
    # no transpose of the entity tile.
    o_ref[...] = lax.dot_general(
        hr_ref[...],
        e_ref[...],
        dimension_numbers=(((1,), (1,)), ((), ())),
        preferred_element_type=jnp.float32,
    ).astype(o_ref.dtype)


def distmult_scores(h, r, entity_table, *, tn=4096, stream_dtype=None,
                    entity_vmem_budget=24 << 20):
    """Compute (h * r) @ entity_table.T with a Pallas kernel.

    h, r:          (B, D)  float32 or bfloat16
    entity_table:  (N, D)  float32 or bfloat16
    stream_dtype:  optional dtype (e.g. jnp.bfloat16) to stream the table and
                   hr in; accumulation stays f32.  None -> table's own dtype.
    returns:       (B, N)  float32
    """
    B, D = h.shape
    N, D2 = entity_table.shape
    assert D == D2, "embedding dimension mismatch"

    # Hoist the grid-invariant h*r out of the per-tile body: compute it once
    # here (B*D elements — trivially small, f32 so v5e's VPU is happy).
    hr = h.astype(jnp.float32) * r.astype(jnp.float32)

    if stream_dtype is not None:
        entity_table = entity_table.astype(stream_dtype)
    hr = hr.astype(entity_table.dtype)

    e_bytes = jnp.dtype(entity_table.dtype).itemsize
    hr_bytes = jnp.dtype(hr.dtype).itemsize

    # ---- Entity-tile selection -------------------------------------------
    # (a) large & lane-dense by default (amortize ~0.35 us/step overhead),
    # (b) clamped so the double-buffered entity tile fits the VMEM budget
    #     (covers large-D configs on v5e/v7x),
    # (c) clamped so small tables still get >= ~4 grid steps (megacore sharding
    #     on v7x + DMA/compute overlap).
    tn_vmem = max(128, (entity_vmem_budget // (2 * D * e_bytes)) // 128 * 128)
    tn_grid = max(128, _round_up(pl.cdiv(N, 4), 128))
    tn_eff = max(128, min(tn, tn_vmem, tn_grid))

    grid = (pl.cdiv(N, tn_eff),)

    # Explicit scoped-VMEM limit: actual double-buffered footprint + headroom,
    # never below 16 MiB, never above a v7x-safe 48 MiB.
    footprint = (2 * tn_eff * D * e_bytes          # entity tile, double-buffered
                 + 2 * B * tn_eff * 4              # output tile, double-buffered
                 + 2 * B * D * hr_bytes)           # resident hr (conservative 2x)
    vmem_limit = min(max(footprint + (4 << 20), 16 << 20), 48 << 20)

    cost = pl.CostEstimate(
        flops=2 * B * N * D,
        transcendentals=0,
        bytes_accessed=N * D * e_bytes + B * N * 4 + B * D * hr_bytes,
    )

    return pl.pallas_call(
        _distmult_kernel,
        out_shape=jax.ShapeDtypeStruct((B, N), jnp.float32),
        grid_spec=pltpu.PrefetchScalarGridSpec(
            num_scalar_prefetch=0,
            grid=grid,
            in_specs=[
                # hr: same block every step -> stays resident in VMEM.
                pl.BlockSpec((B, D), lambda j: (0, 0)),
                # entity table: streamed tile along the entity axis.  The ragged
                # final tile reads unspecified rows past N (safe: those score
                # columns are never written back).
                pl.BlockSpec((tn_eff, D), lambda j: (j, 0)),
            ],
            out_specs=pl.BlockSpec((B, tn_eff), lambda j: (0, j)),
        ),
        compiler_params=pltpu.CompilerParams(
            # Entity-axis grid steps are independent -> shard across TCs (v7x).
            dimension_semantics=("parallel",),
            vmem_limit_bytes=int(vmem_limit),
        ),
        cost_estimate=cost,
    )(hr, entity_table)


class DistMultJAX:
    """JAX/Pallas port of the PyTorch DistMult module."""

    def __init__(self, num_entities, num_relations, dimension, key,
                 param_dtype=jnp.float32, stream_dtype=None):
        bound = 0.01
        k1, k2 = jax.random.split(key)
        # matches nn.init.uniform_(weight, -bound, bound)
        self.entity = jax.random.uniform(
            k1, (num_entities, dimension), jnp.float32, -bound, bound
        ).astype(param_dtype)
        self.relation = jax.random.uniform(
            k2, (num_relations, dimension), jnp.float32, -bound, bound
        ).astype(param_dtype)
        # Set stream_dtype=jnp.bfloat16 for ~2x table-streaming bandwidth on
        # this HBM-bound kernel (f32 accumulation; ~1e-2 relative score error,
        # fine for ranking, not for an exact f32 reference check).
        self.stream_dtype = stream_dtype

    def __call__(self, heads, relations):
        # Embedding lookups (gather) — glue in plain JAX.
        h = self.entity[heads]        # (B, D)
        r = self.relation[relations]  # (B, D)
        # Hot path in Pallas: (h*r) @ entity.T
        return distmult_scores(h, r, self.entity,
                               stream_dtype=self.stream_dtype)


if __name__ == "__main__":
    # Small, deterministic shapes; num_entities deliberately NOT a multiple of
    # the tile size / 128 to exercise the ragged-last-tile (masked-store) path.
    num_entities = 1000
    num_relations = 16
    dimension = 128
    batch = 8

    key = jax.random.PRNGKey(0)
    k_model, k_heads, k_rels = jax.random.split(key, 3)

    # f32 parameters + f32 streaming to match the PyTorch module's numerics
    # exactly for the reference check below.
    model = DistMultJAX(num_entities, num_relations, dimension, k_model)

    heads = jax.random.randint(k_heads, (batch,), 0, num_entities, dtype=jnp.int32)
    relations = jax.random.randint(k_rels, (batch,), 0, num_relations, dtype=jnp.int32)

    scores = model(heads, relations)
    scores = jax.block_until_ready(scores)

    # Reference check against plain JAX.
    h = model.entity[heads]
    r = model.relation[relations]
    ref = (h * r) @ model.entity.T
    assert scores.shape == (batch, num_entities)
    assert jnp.allclose(scores, ref, atol=1e-5, rtol=1e-5)

    print("KERNEL_OK")
</pallas_src>

<mosaic_0001>
module attributes {stable_mosaic.version = 11 : i64} {
  func.func @_distmult_kernel(%arg0: i32, %arg1: memref<8x128xf32, #tpu.memory_space<vmem>>, %arg2: memref<256x128xf32, #tpu.memory_space<vmem>>, %arg3: memref<8x256xf32, #tpu.memory_space<vmem>>) attributes {dimension_semantics = [#tpu.dimension_semantics<parallel>], iteration_bounds = array<i64: 4>, scalar_prefetch = 0 : i64, scratch_operands = 0 : i64, tpu.core_type = #tpu.core_type<tc>, window_params = [{pipeline_mode = #tpu.pipeline_mode<synchronous>, transform_indices = @transform_0, window_bounds = array<i64: 8, 128>}, {transform_indices = @transform_1, window_bounds = array<i64: 256, 128>}, {transform_indices = @transform_2, window_bounds = array<i64: 8, 256>}]} {
    %c0 = arith.constant 0 : index
    %c0_0 = arith.constant 0 : index
    %0 = vector.load %arg1[%c0, %c0_0] : memref<8x128xf32, #tpu.memory_space<vmem>>, vector<8x128xf32>
    %c0_1 = arith.constant 0 : index
    %c0_2 = arith.constant 0 : index
    %1 = vector.load %arg2[%c0_1, %c0_2] : memref<256x128xf32, #tpu.memory_space<vmem>>, vector<256x128xf32>
    %cst = arith.constant dense<0.000000e+00> : vector<8x256xf32>
    %2 = tpu.matmul %0, %1, %cst {dimension_numbers = #tpu.dot_dimension_numbers<[1], [1], [0], [0], [0, 0, 1, 0], [], []>} : vector<8x128xf32>, vector<256x128xf32>, vector<8x256xf32> -> vector<8x256xf32>
    %c0_3 = arith.constant 0 : index
    %c0_4 = arith.constant 0 : index
    %3 = vector.load %arg3[%c0_3, %c0_4] : memref<8x256xf32, #tpu.memory_space<vmem>>, vector<8x256xf32>
    tpu.vector_store %arg3[%c0_3, %c0_4], %2 {strides = array<i32>} : memref<8x256xf32, #tpu.memory_space<vmem>>, vector<8x256xf32>,
    return
  }
  func.func @transform_0(%arg0: i32) -> (i32, i32) {
    %c0_i32 = arith.constant 0 : i32
    %c0_i32_0 = arith.constant 0 : i32
    %c0_i32_1 = arith.constant 0 : i32
    return %c0_i32, %c0_i32_0 : i32, i32
  }
  func.func @transform_1(%arg0: i32) -> (i32, i32) {
    %c0_i32 = arith.constant 0 : i32
    %c0_i32_0 = arith.constant 0 : i32
    return %arg0, %c0_i32 : i32, i32
  }
  func.func @transform_2(%arg0: i32) -> (i32, i32) {
    %c0_i32 = arith.constant 0 : i32
    %c0_i32_0 = arith.constant 0 : i32
    return %c0_i32, %arg0 : i32, i32
  }
}

</mosaic_0001>

<bundles_post_ra>
// kernel: tpu_custom_call.1
= control target key start
LH: loop header
LB: loop body
LE: loop exit
PB: predicated region body
PF: predicated region fallthrough
CT: control target
= control target key end

     0   :  { %7 = vsyncpa [#allocation3], 0  ;;  %s909_s0 = inlined_call_operand.hbm [shape: f32[8,128], index: 0, kind: input, shape index: {}]   ;;  %s910_s1 = inlined_call_operand.hbm [shape: f32[1000,128], index: 1, kind: input, shape index: {}]   ;;  %s911_s2 = inlined_call_operand.hbm [shape: f32[8,1000], index: 2, kind: output, shape index: {}]  }
   0x1   :  { %8 = vsyncpa [#allocation6], 0 }
   0x2   :  { %10 = vsyncpa [#allocation6 + $0x1], 0 }
   0x3   :  { %11 = vsyncpa [#allocation4], 0 }
   0x4   :  { %13 = vsyncpa [#allocation4 + $0x1], 0  ;;  %s679_s9 = smov 0   ;;  %s681_s10 = smov 0  }
   0x5   :  { %s683_s11 = smov 0   ;;  %s685_s12 = smov 0  }
   0x6 LB: > { %s700_s13 = sadd.s32 4294967295, %s657_s12   ;;  %s390_s14 = sadd.s32 4294967294, %s657_s12   ;;  %s657_s12 = sphi %s685_s12, %s932_s12   ;;  %s653_s11 = sphi %s683_s11, %s931_s11   ;;  %s649_s10 = sphi %s681_s10, %s930_s10   ;;  %s645_s9 = sphi %s679_s9, %s929_s9  }
   0x7   : > { %s704_s15 = sadd.s32 1, %s657_s12   ;;  %s47_s16 = sadd.s32 1, %s653_s11 }
   0x8   : > { %s44_s17 = ssub.s32 %s657_s12, %s704_s15  ;;  %p54_p0 = scmp.ne.s32.totalorder %s653_s11, %s649_s10 }
   0x9   : > { %p45_p1 = scmp.eq.s32.totalorder %s44_s17, 0  ;;  %p55_p2 = scmp.eq.s32.totalorder %s657_s12, 0 }
   0xa   : > { %p60_p3 = scmp.ne.s32.totalorder %s649_s10, %s645_s9  ;;  %p912_p4 = scmp.eq.s32.totalorder %s700_s13, 0 }
   0xb   : > { %s716_s18 = scalar_select %p45_p1, %s653_s11, %s47_s16  }
   0xc   : > { %p718_p5 = por %p55_p2, %p54_p0  ;;  %p724_p6 = por %p912_p4, %p60_p3 }
   0xd   : > { %p84_p7 = scmp.eq.s32.totalorder %s700_s13, 3  ;;  %p90_p8 = scmp.eq.s32.totalorder %s390_s14, 3 }
   0xe   : > { %s916_s19 = scalar_select %p718_p5, 1, 0 }
   0xf   : > { %s917_s20 = scalar_select %p724_p6, 1, 0 }
  0x10   : > { %p391_p9 = scmp.ge.s32.totalorder %s657_s12, 1  ;;  %p97_p10 = scmp.lt.s32.totalorder %s657_s12, 5 }
  0x11   : > { %p731_p11 = por %p84_p7, %p54_p0  ;;  %p735_p12 = por %p90_p8, %p60_p3 }
  0x12   : > { %p739_p13 = pnand %p391_p9, %p97_p10  ;;  %s659_s24 = smov [#allocation2]  }
  0x13   : > { %s918_s21 = scalar_select %p731_p11, 1, 0 }
  0x14   : > { %s919_s22 = scalar_select %p735_p12, 1, 0 }
  0x15   : > { %s920_s23 = scalar_select %p739_p13, 1, 0 }
  0x16   : > { %p485_p1 = pneg %p739_p13  ;;  %s110_s25 = sshll.u32 %s659_s24, 4  ;;  %s111_s25 = int_to_ptr.vmem [resolvable:$true] %s110_s25 }
  0x17   : > { %s531_s29 = scalar_lea.hbm %s909_s0, 128 }
  0x18   : > { %p747_p2 = pnand %p485_p1, %p912_p4  ;;  %p532_p0 = scmp.ne.s32.totalorder %s909_s0, %s531_s29 }
  0x19   : > { %p538_p9 = scmp.lt.u32.totalorder %s531_s29, %s909_s0 }
  0x1a   : > { %p533_p3 = pneg %p747_p2 }
  0x1c   : > { %p534_p7 = pnand %p533_p3, %p532_p0 }
  0x1e   : > { %p535_p8 = pneg %p534_p7 }
  0x20   : > { %p540_p10 = pnand %p538_p9, %p535_p8 }
  0x22   : > { %543 = shalt.err (!%p540_p10)
}
  0x23   : > { %s544_s6 = scalar_lea.vmem %s111_s25, 128  ;;  %p552_p11 = scmp.lt.s32.totalorder %s111_s25, %s111_s25 }
  0x24   : > { %p545_p1 = scmp.ne.s32.totalorder %s111_s25, %s544_s6  ;;  %p553_p6 = scmp.lt.s32.totalorder %s544_s6, %s544_s6 }
  0x26   : > { %p547_p4 = pnand %p545_p1, %p533_p3  ;;  %p554_p13 = por %p553_p6, %p552_p11 }
  0x28   : > { %p548_p12 = pneg %p547_p4 }
  0x2a   : > { %p555_p5 = pnand %p554_p13, %p548_p12 }
  0x2c   : > { %558 = shalt.err (!%p555_p5)
}
  0x2d   : > { %488 = dma.hbm_to_vmem [thread:$0]  (!%p747_p2), %s909_s0, 128, %s111_s25, [#allocation3]  }
  0x2e   : > { %p393_p0 = scmp.ge.s32.totalorder %s657_s12, 4 }
  0x2f   : > { %p922_p7 = scmp.ne.s32.totalorder (!%p393_p0), %s916_s19, 0 }
  0x30   : > { %117 = sbr.rel (%p393_p0) target bundleno = 90 (0x5a), region = 20 }
  0x37   : > { %120 = sbr.rel (!%p922_p7) target bundleno = 90 (0x5a), region = 24  ;;  %s121_s14 = sand.u32 (%p922_p7), 1, %s653_s11  }
  0x38   : > { %s395_s16 = sshll.u32 (%p922_p7), %s657_s12, 5  ;;  %s394_s17 = sshll.u32 (%p922_p7), %s121_s14, 8 }
  0x39   : > { %s127_s24 = ssub.s32 (%p922_p7), 125, %s395_s16  ;;  %s775_s28 = scalar_lea.sflag (%p922_p7), [#allocation6], %s121_s14 }
  0x3a   : > { %p128_p4 = scmp.lt.s32.totalorder (%p922_p7), %s127_s24, 32  ;;  %s125_s25 = scalar_lea.vmem (%p922_p7), [#allocation5], %s394_s17 }
  0x3e   : > { %s934_s24 = smov (!%p128_p4, %s127_s24), 32 }
  0x3f   : > { %s772_s27 = sshll.u32 %s934_s24, 7 }
  0x40   : > { %s132_s26 = ssub.s32 4096, %s772_s27 }
  0x41   : > { %133 = vsyncadd %s775_s28, %s132_s26  ;;  %p397_p5 = scmp.ne.s32.totalorder %s772_s27, 0  ;;  %s410_s19 = sshll.u32 %s657_s12, 12 }
  0x42   : > { %s783_s3 = scalar_lea.hbm %s910_s1, %s410_s19  ;;  %s138_s4 = sshll.u32 %s125_s25, 4  ;;  %s785_s4 = int_to_ptr.vmem [resolvable:$true] %s138_s4 }
  0x43   : > { %s559_s5 = scalar_lea.hbm %s783_s3, %s772_s27  ;;  %s563_s8 = scalar_lea.hbm %s910_s1, 16000 }
  0x44   : > { %p560_p6 = scmp.ne.s32.totalorder %s783_s3, %s559_s5  ;;  %p564_p13 = scmp.lt.u32.totalorder %s783_s3, %s910_s1 }
  0x45   : > { %p565_p2 = scmp.lt.u32.totalorder %s563_s8, %s559_s5  ;;  %p567_p8 = scmp.lt.u32.totalorder %s559_s5, %s783_s3 }
  0x46   : > { %p561_p11 = pnand %p560_p6, %p397_p5 }
  0x47   : > { %p566_p3 = por %p565_p2, %p564_p13 }
  0x48   : > { %p562_p12 = pneg %p561_p11 }
  0x49   : > { %p568_p9 = por %p567_p8, %p566_p3 }
  0x4b   : > { %p569_p10 = pnand %p568_p9, %p562_p12 }
  0x4d   : > { %572 = shalt.err (!%p569_p10)
}
  0x4e   : > { %s573_s17 = scalar_lea.vmem %s785_s4, %s772_s27  ;;  %s660_s24 = smov [#allocation5]  }
  0x4f   : > { %p574_p1 = scmp.ne.s32.totalorder %s785_s4, %s573_s17  ;;  %s577_s26 = sshll.u32 %s660_s24, 4  ;;  %s578_s26 = int_to_ptr.vmem [resolvable:$false] %s577_s26 }
  0x50   : > { %s579_s25 = scalar_lea.vmem %s578_s26, 8192  ;;  %p580_p4 = scmp.lt.s32.totalorder %s785_s4, %s578_s26 }
  0x51   : > { %p575_p0 = pnand %p574_p1, %p397_p5  ;;  %p581_p6 = scmp.lt.s32.totalorder %s579_s25, %s573_s17 }
  0x53   : > { %p576_p7 = pneg %p575_p0  ;;  %p582_p11 = por %p581_p6, %p580_p4 }
  0x55   : > { %p583_p13 = pnand %p582_p11, %p576_p7 }
  0x57   : > { %586 = shalt.err (!%p583_p13)
}
  0x58   : > { %s661_s19 = smov 128   ;;  %s662_s29 = smov 8  }
  0x59   : > { %144 = dma.hbm_to_vmem [thread:$0]  (%p397_p5), %s783_s3, %s772_s27, %s785_s4, %s775_s28, %s661_s19, %s661_s19, %s662_s29  }
  0x5a PF: > { %p923_p12 = scmp.ne.s32.totalorder %s920_s23, 0 }
  0x5b   : > { %p924_p2 = scmp.eq.s32.totalorder (!%p923_p12), %s700_s13, 0 }
  0x5c   : > { %150 = sbr.rel (%p923_p12) target bundleno = 398 (0x18e), region = 28 }
  0x63   : > { %632 = dma.done.wait (%p924_p2), [#allocation3], 128   ;;  %p925_p3 = pmov %p924_p2 }
  0x64   : > { %s819_s30 = sand.u32 1, %s649_s10   ;;  %p926_p5 = scmp.ne.s32.totalorder %s917_s20, 0 }
  0x65   : > { %634 = vsyncadd (%p925_p3), [#allocation3], 4294967168  ;;  %s403_s5 = sshll.u32 %s819_s30, 8  ;;  %s157_s6 = scalar_lea.sflag [#allocation6], %s819_s30 }
  0x66   : > { %s823_s27 = scalar_lea.vmem [#allocation5], %s403_s5 }
  0x67   : > { %636 = dma.done.wait (%p926_p5), %s157_s6, 4096  }
  0x68   : > { %638 = vsyncadd (%p926_p5), %s157_s6, 4294963200  ;;  %v204_v0 = vld [vmem:[%s823_s27 + $0x80] sm:$0xff]  ;;  %v205_v1 = vld [vmem:[%s823_s27 + $0x88] sm:$0xff]  ;;  %s404_s20 = sshll.u32 %s819_s30, 4  ;;  %s411_s3 = sshll.u32 %s700_s13, 8 }
  0x69   : > { %v188_v2 = vld [vmem:[%s823_s27] sm:$0xff]  ;;  %v446_v3 = vpack.c.bf16 %v205_v1, %v204_v0  ;;  %v189_v4 = vld [vmem:[%s823_s27 + $0x8] sm:$0xff]  ;;  %v206_v5 = vld [vmem:[%s823_s27 + $0x90] sm:$0xff]  ;;  %s180_s23 = scalar_lea.vmem [#allocation7], %s404_s20  ;;  %s868_s8 = scalar_lea.hbm %s911_s2, %s411_s3 }
  0x6a   : > { %v207_v6 = vld [vmem:[%s823_s27 + $0x98] sm:$0xff]  ;;  %v448_v7 = vpack.c.bf16 %v189_v4, %v188_v2  ;;  %v190_v9 = vld [vmem:[%s823_s27 + $0x10] sm:$0xff]  ;;  %v208_v11 = vld [vmem:[%s823_s27 + $0xa0] sm:$0xff]  ;;  %s308_s28 = sshll.u32 %s180_s23, 4  ;;  %s294_s14 = scalar_lea.sflag [#allocation4], %s819_s30  ;;  %s863_s28 = int_to_ptr.vmem [resolvable:$true] %s308_s28 }
  0x6b   : > { %v450_v8 = vpack.c.bf16 %v207_v6, %v206_v5  ;;  %447 = vmatprep.subr.bf16.mxu0 %v446_v3  ;;  %v191_v10 = vld [vmem:[%s823_s27 + $0x18] sm:$0xff]  ;;  %v209_v12 = vld [vmem:[%s823_s27 + $0xa8] sm:$0xff]  ;;  %v192_v16 = vld [vmem:[%s823_s27 + $0x20] sm:$0xff]  ;;  %s587_s16 = scalar_lea.vmem %s863_s28, 256  ;;  %p927_p9 = scmp.ne.s32.totalorder %s918_s21, 0 }
  0x6c   : > { %449 = vmatpush3.bf16.xpose.msra.mxu0 %v448_v7  ;;  %v452_v13 = vpack.c.bf16 %v191_v10, %v190_v9  ;;  %v454_v14 = vpack.c.bf16 %v209_v12, %v208_v11  ;;  %v187_v15 = vld [vmem:[#allocation2] sm:$0xff]  ;;  %v193_v17 = vld [vmem:[%s823_s27 + $0x28] sm:$0xff]  ;;  %v210_v18 = vld [vmem:[%s823_s27 + $0xb0] sm:$0xff]  ;;  %p588_p8 = scmp.ne.s32.totalorder %s863_s28, %s587_s16  ;;  %s663_s13 = smov [#allocation7]  }
  0x6d   : > { %451 = vmatprep.subr.bf16.mxu0 %v450_v8  ;;  %444 = vmatprep.mubr.f32.mxu0 %v187_v15  ;;  %v211_v19 = vld [vmem:[%s823_s27 + $0xb8] sm:$0xff]  ;;  %v456_v20 = vpack.c.bf16 %v193_v17, %v192_v16  ;;  %v194_v22 = vld [vmem:[%s823_s27 + $0x30] sm:$0xff]  ;;  %v212_v24 = vld [vmem:[%s823_s27 + $0xc0] sm:$0xff]  ;;  %s591_s17 = sshll.u32 %s663_s13, 4  ;;  %s592_s17 = int_to_ptr.vmem [resolvable:$false] %s591_s17 }
  0x6e   : > { %v458_v21 = vpack.c.bf16 %v211_v19, %v210_v18  ;;  %v195_v23 = vld [vmem:[%s823_s27 + $0x38] sm:$0xff]  ;;  %v213_v25 = vld [vmem:[%s823_s27 + $0xc8] sm:$0xff]  ;;  %v196_v28 = vld [vmem:[%s823_s27 + $0x40] sm:$0xff]  ;;  %p589_p10 = pnand %p588_p8, %p927_p9  ;;  %s593_s24 = scalar_lea.vmem %s592_s17, 512 }
  0x6f   : > { %v460_v26 = vpack.c.bf16 %v195_v23, %v194_v22  ;;  %v462_v27 = vpack.c.bf16 %v213_v25, %v212_v24  ;;  %v197_v29 = vld [vmem:[%s823_s27 + $0x48] sm:$0xff]  ;;  %v214_v30 = vld [vmem:[%s823_s27 + $0xd0] sm:$0xff]  ;;  %v215_v31 = vld [vmem:[%s823_s27 + $0xd8] sm:$0xff]  ;;  %p594_p0 = scmp.lt.s32.totalorder %s863_s28, %s592_s17  ;;  %p595_p7 = scmp.lt.s32.totalorder %s593_s24, %s587_s16 }
  0x70   : > { %v464_v32 = vpack.c.bf16 %v197_v29, %v196_v28  ;;  %v466_v33 = vpack.c.bf16 %v215_v31, %v214_v30  ;;  %v198_v34 = vld [vmem:[%s823_s27 + $0x50] sm:$0xff]  ;;  %v199_v35 = vld [vmem:[%s823_s27 + $0x58] sm:$0xff]  ;;  %v216_v36 = vld [vmem:[%s823_s27 + $0xe0] sm:$0xff]  ;;  %p590_p1 = pneg %p589_p10 }
  0x71   : > { %v217_v37 = vld [vmem:[%s823_s27 + $0xe8] sm:$0xff]  ;;  %v468_v38 = vpack.c.bf16 %v199_v35, %v198_v34  ;;  %v200_v40 = vld [vmem:[%s823_s27 + $0x60] sm:$0xff]  ;;  %v218_v42 = vld [vmem:[%s823_s27 + $0xf0] sm:$0xff]  ;;  %p596_p4 = por %p595_p7, %p594_p0 }
  0x72   : > { %v470_v39 = vpack.c.bf16 %v217_v37, %v216_v36  ;;  %v201_v41 = vld [vmem:[%s823_s27 + $0x68] sm:$0xff]  ;;  %v219_v43 = vld [vmem:[%s823_s27 + $0xf8] sm:$0xff]  ;;  %v202_v46 = vld [vmem:[%s823_s27 + $0x70] sm:$0xff] }
  0x73   : > { %v472_v44 = vpack.c.bf16 %v201_v41, %v200_v40  ;;  %v474_v45 = vpack.c.bf16 %v219_v43, %v218_v42  ;;  %v203_v47 = vld [vmem:[%s823_s27 + $0x78] sm:$0xff]  ;;  %p597_p6 = pnand %p596_p4, %p590_p1 }
  0x74   : > { %453 = vmatpush3.bf16.xpose.msra.mxu0 %v452_v13  ;;  %v476_v48 = vpack.c.bf16 %v203_v47, %v202_v46 }
  0x75   : > { %455 = vmatprep.subr.bf16.mxu0 %v454_v14 }
  0x7c   : > { %457 = vmatpush3.bf16.xpose.msra.mxu0 %v456_v20 }
  0x7d   : > { %459 = vmatprep.subr.bf16.mxu0 %v458_v21 }
  0x84   : > { %461 = vmatpush3.bf16.xpose.msra.mxu0 %v460_v26 }
  0x85   : > { %463 = vmatprep.subr.bf16.mxu0 %v462_v27 }
  0x8c   : > { %465 = vmatpush3.bf16.xpose.msra.mxu0 %v464_v32 }
  0x8d   : > { %467 = vmatprep.subr.bf16.mxu0 %v466_v33 }
  0x94   : > { %469 = vmatpush3.bf16.xpose.msra.mxu0 %v468_v38 }
  0x95   : > { %471 = vmatprep.subr.bf16.mxu0 %v470_v39 }
  0x9c   : > { %473 = vmatpush3.bf16.xpose.msra.mxu0 %v472_v44 }
  0x9d   : > { %475 = vmatprep.subr.bf16.mxu0 %v474_v45 }
  0xa4   : > { %477 = vmatpush3.bf16.xpose.msra.mxu0 %v476_v48 }
  0xab   : > { %445 = vmatmul.mubr.f32.vlgmr.msra.gmra.mrb[0].mxu0 %v187_v15 }
 0x17e   : > { %v286_v49 = vpop.f32.mrb[0].mxu0 }
 0x17f   : > { %291 = vst [vmem:[%s180_s23] sm:$0xff] %v286_v49  ;;  %v288_v50 = vpop.f32.mrb[1].mxu0 }
 0x180   : > { %292 = vst [vmem:[%s180_s23 + $0x8] sm:$0xff] %v288_v50 }
 0x181   : > { %600 = shalt.err (!%p597_p6)
}
 0x182   : > { %s601_s26 = scalar_lea.hbm %s868_s8, 256  ;;  %s605_s29 = scalar_lea.hbm %s911_s2, 1024 }
 0x183   : > { %p602_p11 = scmp.ne.s32.totalorder %s868_s8, %s601_s26  ;;  %p606_p2 = scmp.lt.u32.totalorder %s868_s8, %s911_s2 }
 0x184   : > { %p607_p3 = scmp.lt.u32.totalorder %s605_s29, %s601_s26  ;;  %p609_p8 = scmp.lt.u32.totalorder %s601_s26, %s868_s8 }
 0x185   : > { %p603_p13 = pnand %p602_p11, %p927_p9 }
 0x186   : > { %p608_p5 = por %p607_p3, %p606_p2 }
 0x187   : > { %p604_p12 = pneg %p603_p13 }
 0x188   : > { %p610_p10 = por %p609_p8, %p608_p5 }
 0x18a   : > { %p611_p1 = pnand %p610_p10, %p604_p12 }
 0x18c   : > { %614 = shalt.err (!%p611_p1)
}
 0x18d   : > { %483 = dma.vmem_to_hbm [thread:$0]  (%p927_p9), %s863_s28, 256, %s868_s8, %s294_s14  }
 0x18e PF: > { %p495_p0 = scmp.ge.s32.totalorder %s657_s12, 2  ;;  %s320_s6 = sand.u32 1, %s645_s9  }
 0x18f   : > { %p928_p7 = scmp.ne.s32.totalorder %s919_s22, 0  ;;  %s321_s27 = scalar_lea.sflag [#allocation4], %s320_s6 }
 0x191   : > { %p490_p4 = pnand %p495_p0, %p928_p7 }
 0x193   : > { %640 = dma.done.wait (!%p490_p4), %s321_s27, 256  }
 0x194   : > { %642 = vsyncadd (!%p490_p4), %s321_s27, 4294967040  ;;  %p16_p6 = scmp.ge.s32.totalorder %s704_s15, 6   ;;  %s929_s9 = smov %s649_s10 }
 0x195   : > { %s930_s10 = smov %s653_s11  ;;  %s931_s11 = smov %s716_s18 }
 0x196   : > { %s932_s12 = smov %s704_s15  ;;  %18 = sbr.rel (!%p16_p6) target bundleno = 6 (0x6), region = 78 }
 0x19d   :  { %326 = vsyncpa [#allocation3], 1 }
 0x19e   :  { %328 = vsyncpa [#allocation3 + $0x1], 1 }
 0x19f   :  { %329 = vsyncpa [#allocation6], 1 }
 0x1a0   :  { %331 = vsyncpa [#allocation6 + $0x1], 1 }
 0x1a1   :  { %332 = vsyncpa [#allocation4], 1 }
 0x1a2   :  { %334 = vsyncpa [#allocation4 + $0x1], 1 }

</bundles_post_ra>
